<compile_context>
chip_gen: v7x
topology: tpu7x:2x2x1
jax: 0.10.0
libtpu: 0.0.40
codegen_flags: <defaults>
</compile_context>

<pallas_src>
import jax
import jax.numpy as jnp
from jax.experimental import pallas as pl
from jax.experimental.pallas import tpu as pltpu

LANE = 128


def _round_up(x, m):
    return ((x + m - 1) // m) * m


def presup_kernel(x_ref, w_ref, p_ref):
    """P[s] = X @ W_s (bf16 operands, f32 MXU accumulation, bf16 store)."""
    s_total = w_ref.shape[0]
    for s in range(s_total):                       # static unroll, S is small
        p_ref[s] = jnp.dot(
            x_ref[...], w_ref[s], preferred_element_type=jnp.float32
        ).astype(p_ref.dtype)


def gcn_rowblock_kernel(a_ref, p_ref, b_ref, o_ref):
    """One row block: out = relu( sum_s A_s_block @ P_s + b )."""
    s_total = a_ref.shape[0]
    acc = jnp.dot(a_ref[0], p_ref[0], preferred_element_type=jnp.float32)
    for s in range(1, s_total):                    # static unroll over supports
        acc = acc + jnp.dot(a_ref[s], p_ref[s],
                            preferred_element_type=jnp.float32)
    o_ref[...] = jnp.maximum(acc + b_ref[...], 0.0).astype(o_ref.dtype)


def graph_convolution(x, supports, weights, bias, *, tm=256):
    """x: [N, D_in] f32, supports: [S, N, N] f32 (densified sparse supports),
    weights: [S, D_in, D_out] f32, bias: [D_out] f32  ->  [N, D_out] f32."""
    S, N, _ = supports.shape
    _, d_in, d_out = weights.shape
    d_pad = _round_up(d_out, LANE)                 # lane-dense output width

    # Row block: multiple of 16 (bf16 sublane tile); shrink for tiny graphs.
    # For real mesh sizes (N=618/2466) use tm=256..512.
    tm = _round_up(min(tm, _round_up(N, 16)), 16)
    n_pad = _round_up(N, tm)

    # bf16 operands (f32 accumulation happens on the MXU inside the kernels).
    # NOTE: in a real pipeline cast/pad the supports ONCE and reuse them across
    # layers/iterations; here it is one fused cast+pad pass in the wrapper.
    x_bf = jnp.pad(x, ((0, n_pad - N), (0, 0))).astype(jnp.bfloat16)
    a_bf = jnp.pad(
        supports, ((0, 0), (0, n_pad - N), (0, n_pad - N))
    ).astype(jnp.bfloat16)
    w_bf = jnp.pad(weights, ((0, 0), (0, 0), (0, d_pad - d_out))).astype(jnp.bfloat16)
    b_pad = jnp.pad(bias, (0, d_pad - d_out)).reshape(1, d_pad).astype(jnp.float32)

    # ---- Kernel 1: pre_sup[s] = X @ W_s  (tiny; whole arrays fit VMEM) ----
    pre_sup = pl.pallas_call(
        presup_kernel,
        out_shape=jax.ShapeDtypeStruct((S, n_pad, d_pad), jnp.bfloat16),
        compiler_params=pltpu.CompilerParams(vmem_limit_bytes=32 * 1024 * 1024),
    )(x_bf, w_bf)

    # ---- Kernel 2: row-blocked  sum_s A_s @ P_s  + bias, ReLU ----
    grid = (n_pad // tm,)

    # VMEM budget: double-buffered A row blocks + resident P (2 bufs) + output
    # blocks + bias; 1.5x headroom, capped under v7x's 64 MiB physical VMEM.
    a_block_bytes = 2 * S * tm * n_pad * 2
    p_bytes = 2 * S * n_pad * d_pad * 2
    out_bytes = 2 * tm * d_pad * 4
    need = a_block_bytes + p_bytes + out_bytes + (1 << 20)
    vmem_limit = max(32 * 1024 * 1024, min(int(need * 1.5), 60 * 1024 * 1024))

    out = pl.pallas_call(
        gcn_rowblock_kernel,
        out_shape=jax.ShapeDtypeStruct((n_pad, d_pad), jnp.float32),
        grid=grid,
        in_specs=[
            pl.BlockSpec((S, tm, n_pad), lambda i: (0, i, 0)),      # A row block (streamed)
            pl.BlockSpec((S, n_pad, d_pad), lambda i: (0, 0, 0)),   # P (resident)
            pl.BlockSpec((1, d_pad), lambda i: (0, 0)),             # bias (resident)
        ],
        out_specs=pl.BlockSpec((tm, d_pad), lambda i: (i, 0)),
        compiler_params=pltpu.CompilerParams(
            dimension_semantics=("parallel",),     # row blocks independent -> 2 TCs on v7x
            vmem_limit_bytes=vmem_limit,
        ),
    )(a_bf, pre_sup, b_pad)

    # Downstream consumers that accept the padded (n_pad, 128) slab can use
    # `out` directly; slice only to return the exact module shape here.
    return out[:N, :d_out]


def glorot(key, shape):
    # Deterministic glorot-uniform init (matches the reference module's shapes).
    fan_in, fan_out = shape[-2], shape[-1]
    limit = jnp.sqrt(6.0 / (fan_in + fan_out))
    return jax.random.uniform(key, shape, jnp.float32, -limit, limit)


if __name__ == "__main__":
    key = jax.random.PRNGKey(0)
    k_x, k_adj, k_w, k_b = jax.random.split(key, 4)

    N = 300       # vertices; deliberately not a multiple of 16/128 to test padding
    D_IN = 48     # input feature dim
    D_OUT = 64    # output feature dim
    S = 2         # number of supports (len(self.support))

    x = jax.random.normal(k_x, (N, D_IN), jnp.float32)

    # Synthetic sparse-ish, row-normalized supports (like normalized adjacency).
    raw = jax.random.uniform(k_adj, (S, N, N), jnp.float32)
    adj = jnp.where(raw > 0.9, raw, 0.0)           # ~10% nonzeros, densified
    supports = adj / (jnp.sum(adj, axis=-1, keepdims=True) + 1e-6)

    weights = glorot(k_w, (S, D_IN, D_OUT))
    # Module inits bias to zeros; use a nonzero bias here so the bias path is tested.
    bias = 0.5 * jax.random.normal(k_b, (D_OUT,), jnp.float32)

    # tm=128 so the demo exercises a multi-step row-blocked grid (N=300 -> 3 blocks).
    out = graph_convolution(x, supports, weights, bias, tm=128)
    out = jax.block_until_ready(out)
    assert out.shape == (N, D_OUT)

    # (a) Tight check vs a reference that mirrors the kernel's bf16 operand /
    #     pre_sup quantization (f32 accumulation both ways).
    f32 = jnp.float32
    xb = x.astype(jnp.bfloat16).astype(f32)
    ab = supports.astype(jnp.bfloat16).astype(f32)
    wb = weights.astype(jnp.bfloat16).astype(f32)
    pre = [(xb @ wb[i]).astype(jnp.bfloat16).astype(f32) for i in range(S)]
    ref_bf = sum(ab[i] @ pre[i] for i in range(S)) + bias
    ref_bf = jnp.maximum(ref_bf, 0.0)
    assert jnp.allclose(out, ref_bf, atol=2e-2, rtol=2e-2), \
        "mismatch vs bf16-mirrored reference"

    # (b) Loose check vs the original f32 math of the PyTorch forward
    #     (difference is bf16 operand / pre_sup quantization only).
    ref = sum(supports[i] @ (x @ weights[i]) for i in range(S)) + bias
    ref = jnp.maximum(ref, 0.0)
    max_err = float(jnp.max(jnp.abs(out - ref)))
    assert max_err < 0.1, f"f32-reference deviation too large: {max_err}"

    print("KERNEL_OK")
</pallas_src>

<mosaic_0001>
module attributes {stable_mosaic.version = 11 : i64} {
  func.func @presup_kernel(%arg0: memref<384x48xbf16, #tpu.memory_space<vmem>>, %arg1: memref<2x48x128xbf16, #tpu.memory_space<vmem>>, %arg2: memref<2x384x128xbf16, #tpu.memory_space<vmem>>) attributes {dimension_semantics = [], scalar_prefetch = 0 : i64, scratch_operands = 0 : i64, tpu.core_type = #tpu.core_type<tc>} {
    %c0 = arith.constant 0 : index
    %c0_0 = arith.constant 0 : index
    %0 = vector.load %arg0[%c0, %c0_0] : memref<384x48xbf16, #tpu.memory_space<vmem>>, vector<384x48xbf16>
    %c0_1 = arith.constant 0 : index
    %c0_2 = arith.constant 0 : index
    %c0_3 = arith.constant 0 : index
    %1 = vector.load %arg1[%c0_1, %c0_2, %c0_3] : memref<2x48x128xbf16, #tpu.memory_space<vmem>>, vector<1x48x128xbf16>
    %2 = vector.shape_cast %1 : vector<1x48x128xbf16> to vector<48x128xbf16>
    %cst = arith.constant dense<0.000000e+00> : vector<384x128xf32>
    %3 = tpu.matmul %0, %2, %cst {dimension_numbers = #tpu.dot_dimension_numbers<[1], [0], [0], [1], [0, 0, 1, 1], [], []>} : vector<384x48xbf16>, vector<48x128xbf16>, vector<384x128xf32> -> vector<384x128xf32>
    %4 = arith.truncf %3 : vector<384x128xf32> to vector<384x128xbf16>
    %c0_4 = arith.constant 0 : index
    %c0_5 = arith.constant 0 : index
    %c0_6 = arith.constant 0 : index
    %5 = vector.load %arg2[%c0_4, %c0_5, %c0_6] : memref<2x384x128xbf16, #tpu.memory_space<vmem>>, vector<1x384x128xbf16>
    %6 = vector.shape_cast %5 : vector<1x384x128xbf16> to vector<384x128xbf16>
    %7 = vector.shape_cast %4 : vector<384x128xbf16> to vector<1x384x128xbf16>
    tpu.vector_store %arg2[%c0_4, %c0_5, %c0_6], %7 {strides = array<i32>} : memref<2x384x128xbf16, #tpu.memory_space<vmem>>, vector<1x384x128xbf16>,
    %c0_7 = arith.constant 0 : index
    %c0_8 = arith.constant 0 : index
    %8 = vector.load %arg0[%c0_7, %c0_8] : memref<384x48xbf16, #tpu.memory_space<vmem>>, vector<384x48xbf16>
    %c1 = arith.constant 1 : index
    %c0_9 = arith.constant 0 : index
    %c0_10 = arith.constant 0 : index
    %9 = vector.load %arg1[%c1, %c0_9, %c0_10] : memref<2x48x128xbf16, #tpu.memory_space<vmem>>, vector<1x48x128xbf16>
    %10 = vector.shape_cast %9 : vector<1x48x128xbf16> to vector<48x128xbf16>
    %cst_11 = arith.constant dense<0.000000e+00> : vector<384x128xf32>
    %11 = tpu.matmul %8, %10, %cst_11 {dimension_numbers = #tpu.dot_dimension_numbers<[1], [0], [0], [1], [0, 0, 1, 1], [], []>} : vector<384x48xbf16>, vector<48x128xbf16>, vector<384x128xf32> -> vector<384x128xf32>
    %12 = arith.truncf %11 : vector<384x128xf32> to vector<384x128xbf16>
    %c1_12 = arith.constant 1 : index
    %c0_13 = arith.constant 0 : index
    %c0_14 = arith.constant 0 : index
    %13 = vector.load %arg2[%c1_12, %c0_13, %c0_14] : memref<2x384x128xbf16, #tpu.memory_space<vmem>>, vector<1x384x128xbf16>
    %14 = vector.shape_cast %13 : vector<1x384x128xbf16> to vector<384x128xbf16>
    %15 = vector.shape_cast %12 : vector<384x128xbf16> to vector<1x384x128xbf16>
    tpu.vector_store %arg2[%c1_12, %c0_13, %c0_14], %15 {strides = array<i32>} : memref<2x384x128xbf16, #tpu.memory_space<vmem>>, vector<1x384x128xbf16>,
    return
  }
}

</mosaic_0001>

<bundles_post_ra>
// kernel: tpu_custom_call.1
= control target key start
LH: loop header
LB: loop body
LE: loop exit
PB: predicated region body
PF: predicated region fallthrough
CT: control target
= control target key end

     0   :  { %vm205_vm0 = vcmask 392192   ;;  %s2559_s0 = inlined_call_operand.vmem [shape: bf16[384,48], index: 0, kind: input, shape index: {}]   ;;  %s2560_s1 = inlined_call_operand.vmem [shape: bf16[2,48,128], index: 1, kind: input, shape index: {}]   ;;  %s2561_s2 = inlined_call_operand.hbm [shape: bf16[2,384,128], index: 2, kind: output, shape index: {}]  }
   0x1   :  { %v2241_v0 = vld [vmem:[%s2560_s1] sm:$0xff]   ;;  %v2242_v1 = vld [vmem:[%s2560_s1 + $0x18] sm:$0xff]   ;;  %v2243_v2 = vld [vmem:[%s2560_s1 + $0x8] sm:$0xff]  }
   0x2   :  { %2130 = vmatprep.subr.bf16.mxu0 %v2241_v0  ;;  %2184 = vmatprep.subr.bf16.mxu1 %v2242_v1  ;;  %v2244_v3 = vld [vmem:[%s2560_s1 + $0x20] sm:$0xff]   ;;  %v2245_v4 = vld [vmem:[%s2560_s1 + $0x10] sm:$0xff]   ;;  %v2246_v5 = vld [vmem:[%s2560_s1 + $0x28] sm:$0xff]  }
   0x3   :  { %2131 = vmatpush3.bf16.msra.mxu0 %v2241_v0  ;;  %2185 = vmatpush3.bf16.msra.mxu1 %v2242_v1  ;;  %v2247_v6 = vld [vmem:[%s2559_s0] sm:$0xff]   ;;  %v2249_v8 = vld [vmem:[%s2559_s0 + $0x8] sm:$0xff]   ;;  %v2251_v10 = vld [vmem:[%s2559_s0 + $0x10] sm:$0xff]  }
   0x4   :  { %2132 = vmatprep.subr.bf16.mxu0 %v2243_v2  ;;  %2186 = vmatprep.subr.bf16.mxu1 %v2244_v3  ;;  %v2248_v7 = vld [vmem:[%s2559_s0] sm:$0xff]   ;;  %v2250_v9 = vld [vmem:[%s2559_s0 + $0x8] sm:$0xff]   ;;  %v2252_v11 = vld [vmem:[%s2559_s0 + $0x10] sm:$0xff]  }
   0x5   :  { %2136 = vmatprep.mubr.msk.bf16.mxu0 %vm205_vm0, %v2247_v6  ;;  %2190 = vmatprep.mubr.msk.bf16.mxu1 %vm205_vm0, %v2248_v7  ;;  %v2253_v12 = vld [vmem:[%s2559_s0 + $0x18] sm:$0xff]   ;;  %v2255_v14 = vld [vmem:[%s2559_s0 + $0x20] sm:$0xff]   ;;  %v2257_v16 = vld [vmem:[%s2559_s0 + $0x28] sm:$0xff]  }
   0x6   :  { %v2254_v13 = vld [vmem:[%s2559_s0 + $0x18] sm:$0xff]   ;;  %v2256_v15 = vld [vmem:[%s2559_s0 + $0x20] sm:$0xff]   ;;  %v2258_v17 = vld [vmem:[%s2559_s0 + $0x28] sm:$0xff]  }
   0x7   :  { %2133 = vmatpush3.bf16.msra.mxu0 %v2243_v2  ;;  %2187 = vmatpush3.bf16.msra.mxu1 %v2244_v3  ;;  %v2259_v18 = vld [vmem:[%s2559_s0 + $0x30] sm:$0xff]   ;;  %v2261_v20 = vld [vmem:[%s2559_s0 + $0x38] sm:$0xff]   ;;  %v2263_v22 = vld [vmem:[%s2559_s0 + $0x40] sm:$0xff]  }
   0x8   :  { %2134 = vmatprep.subr.bf16.mxu0 %v2245_v4  ;;  %2188 = vmatprep.subr.bf16.mxu1 %v2246_v5  ;;  %v2260_v19 = vld [vmem:[%s2559_s0 + $0x30] sm:$0xff]   ;;  %v2262_v21 = vld [vmem:[%s2559_s0 + $0x38] sm:$0xff]   ;;  %v2264_v23 = vld [vmem:[%s2559_s0 + $0x40] sm:$0xff]  }
   0x9   :  { %v2265_v24 = vld [vmem:[%s2559_s0 + $0x48] sm:$0xff]   ;;  %v2267_v26 = vld [vmem:[%s2559_s0 + $0x50] sm:$0xff]   ;;  %v2269_v28 = vld [vmem:[%s2559_s0 + $0x58] sm:$0xff]  }
   0xa   :  { %v2266_v25 = vld [vmem:[%s2559_s0 + $0x48] sm:$0xff]   ;;  %v2268_v27 = vld [vmem:[%s2559_s0 + $0x50] sm:$0xff]   ;;  %v2270_v29 = vld [vmem:[%s2559_s0 + $0x58] sm:$0xff]  }
   0xb   :  { %2135 = vmatpush3.bf16.msra.mxu0 %v2245_v4  ;;  %2189 = vmatpush3.bf16.msra.mxu1 %v2246_v5  ;;  %v2271_v30 = vld [vmem:[%s2559_s0 + $0x60] sm:$0xff]  }
   0xc   :  { %v2272_v31 = vld [vmem:[%s2559_s0 + $0x60] sm:$0xff]  }
   0xe   :  { %2137 = vmatmul.mubr.msk.bf16.vlgmr.msra.gmra.mrb[0].mxu0 %vm205_vm0, %v2249_v8  ;;  %2191 = vmatmul.mubr.msk.bf16.vlgmr.msra.gmra.mrb[0].mxu1 %vm205_vm0, %v2250_v9 }
   0xf   :  { %2140 = vmatprep.mubr.msk.bf16.mxu0 %vm205_vm0, %v2251_v10  ;;  %2194 = vmatprep.mubr.msk.bf16.mxu1 %vm205_vm0, %v2252_v11 }
  0x16   :  { %2141 = vmatmul.mubr.msk.bf16.gmra.mrb[4].mxu0 %vm205_vm0, %v2253_v12  ;;  %2195 = vmatmul.mubr.msk.bf16.gmra.mrb[4].mxu1 %vm205_vm0, %v2254_v13 }
  0x17   :  { %2144 = vmatprep.mubr.msk.bf16.mxu0 %vm205_vm0, %v2255_v14  ;;  %2198 = vmatprep.mubr.msk.bf16.mxu1 %vm205_vm0, %v2256_v15 }
  0x1e   :  { %2145 = vmatmul.mubr.msk.bf16.gmra.mrb[8].mxu0 %vm205_vm0, %v2257_v16  ;;  %2199 = vmatmul.mubr.msk.bf16.gmra.mrb[8].mxu1 %vm205_vm0, %v2258_v17 }
  0x1f   :  { %2148 = vmatprep.mubr.msk.bf16.mxu0 %vm205_vm0, %v2259_v18  ;;  %2202 = vmatprep.mubr.msk.bf16.mxu1 %vm205_vm0, %v2260_v19 }
  0x26   :  { %2149 = vmatmul.mubr.msk.bf16.gmra.mrb[12].mxu0 %vm205_vm0, %v2261_v20  ;;  %2203 = vmatmul.mubr.msk.bf16.gmra.mrb[12].mxu1 %vm205_vm0, %v2262_v21 }
  0x27   :  { %2152 = vmatprep.mubr.msk.bf16.mxu0 %vm205_vm0, %v2263_v22  ;;  %2206 = vmatprep.mubr.msk.bf16.mxu1 %vm205_vm0, %v2264_v23 }
  0x2e   :  { %2153 = vmatmul.mubr.msk.bf16.gmra.mrb[16].mxu0 %vm205_vm0, %v2265_v24  ;;  %2207 = vmatmul.mubr.msk.bf16.gmra.mrb[16].mxu1 %vm205_vm0, %v2266_v25 }
  0x2f   :  { %2156 = vmatprep.mubr.msk.bf16.mxu0 %vm205_vm0, %v2267_v26  ;;  %2210 = vmatprep.mubr.msk.bf16.mxu1 %vm205_vm0, %v2268_v27 }
  0x36   :  { %2157 = vmatmul.mubr.msk.bf16.gmra.mrb[20].mxu0 %vm205_vm0, %v2269_v28 }
  0x37   :  { %7 = vsyncpa [#allocation3], 0  ;;  %2211 = vmatmul.mubr.msk.bf16.gmra.mrb[20].mxu1 %vm205_vm0, %v2270_v29  ;;  %2160 = vmatprep.mubr.msk.bf16.mxu0 %vm205_vm0, %v2271_v30  ;;  %v2273_v32 = vld [vmem:[%s2559_s0 + $0x68] sm:$0xff]   ;;  %v2275_v34 = vld [vmem:[%s2559_s0 + $0x70] sm:$0xff]  }
  0x38   :  { %2214 = vmatprep.mubr.msk.bf16.mxu1 %vm205_vm0, %v2272_v31  ;;  %v2274_v33 = vld [vmem:[%s2559_s0 + $0x68] sm:$0xff]   ;;  %v2276_v35 = vld [vmem:[%s2559_s0 + $0x70] sm:$0xff]   ;;  %v2277_v36 = vld [vmem:[%s2559_s0 + $0x78] sm:$0xff]  }
  0x39   :  { %v2278_v37 = vld [vmem:[%s2559_s0 + $0x78] sm:$0xff]   ;;  %v2279_v38 = vld [vmem:[%s2559_s0 + $0x80] sm:$0xff]   ;;  %v2281_v40 = vld [vmem:[%s2559_s0 + $0x88] sm:$0xff]  }
  0x3a   :  { %v2280_v39 = vld [vmem:[%s2559_s0 + $0x80] sm:$0xff]   ;;  %v2282_v41 = vld [vmem:[%s2559_s0 + $0x88] sm:$0xff]   ;;  %v2283_v42 = vld [vmem:[%s2559_s0 + $0x90] sm:$0xff]  }
  0x3b   :  { %v2284_v43 = vld [vmem:[%s2559_s0 + $0x90] sm:$0xff]   ;;  %v2285_v44 = vld [vmem:[%s2559_s0 + $0x98] sm:$0xff]   ;;  %v2287_v46 = vld [vmem:[%s2559_s0 + $0xa0] sm:$0xff]  }
  0x3c   :  { %v2286_v45 = vld [vmem:[%s2559_s0 + $0x98] sm:$0xff]   ;;  %v2288_v47 = vld [vmem:[%s2559_s0 + $0xa0] sm:$0xff]   ;;  %v2289_v48 = vld [vmem:[%s2559_s0 + $0xa8] sm:$0xff]  }
  0x3d   :  { %v2290_v49 = vld [vmem:[%s2559_s0 + $0xa8] sm:$0xff]   ;;  %v2291_v50 = vld [vmem:[%s2559_s0 + $0xb0] sm:$0xff]   ;;  %v2293_v52 = vld [vmem:[%s2559_s0 + $0xb8] sm:$0xff]  }
  0x3e   :  { %2161 = vmatmul.mubr.msk.bf16.gmra.mrb[24].mxu0 %vm205_vm0, %v2273_v32  ;;  %v2292_v51 = vld [vmem:[%s2559_s0 + $0xb0] sm:$0xff]   ;;  %v2294_v53 = vld [vmem:[%s2559_s0 + $0xb8] sm:$0xff]   ;;  %s2319_s0 = smov [#allocation2]  }
  0x3f   :  { %2215 = vmatmul.mubr.msk.bf16.gmra.mrb[24].mxu1 %vm205_vm0, %v2274_v33  ;;  %2164 = vmatprep.mubr.msk.bf16.mxu0 %vm205_vm0, %v2275_v34  ;;  %s1479_s29 = sshll.u32 %s2319_s0, 4  ;;  %s1480_s29 = int_to_ptr.vmem [resolvable:$true] %s1479_s29 }
  0x40   :  { %2218 = vmatprep.mubr.msk.bf16.mxu1 %vm205_vm0, %v2276_v35  ;;  %s2295_s30 = scalar_lea.vmem %s1480_s29, 6144  ;;  %p2300_p1 = scmp.lt.s32.totalorder %s1480_s29, %s1480_s29 }
  0x41   :  { %p2296_p0 = scmp.ne.s32.totalorder %s1480_s29, %s2295_s30  ;;  %p2301_p2 = scmp.lt.s32.totalorder %s2295_s30, %s2295_s30 }
  0x43   :  { %p2302_p3 = por %p2301_p2, %p2300_p1 }
  0x45   :  { %p2303_p4 = pnand %p2302_p3, %p2296_p0 }
  0x46   :  { %2165 = vmatmul.mubr.msk.bf16.gmra.mrb[28].mxu0 %vm205_vm0, %v2277_v36 }
  0x47   :  { %2219 = vmatmul.mubr.msk.bf16.gmra.mrb[28].mxu1 %vm205_vm0, %v2278_v37  ;;  %2168 = vmatprep.mubr.msk.bf16.mxu0 %vm205_vm0, %v2279_v38 }
  0x48   :  { %2222 = vmatprep.mubr.msk.bf16.mxu1 %vm205_vm0, %v2280_v39 }
  0x4e   :  { %2169 = vmatmul.mubr.msk.bf16.gmra.mrb[32].mxu0 %vm205_vm0, %v2281_v40 }
  0x4f   :  { %2223 = vmatmul.mubr.msk.bf16.gmra.mrb[32].mxu1 %vm205_vm0, %v2282_v41  ;;  %2172 = vmatprep.mubr.msk.bf16.mxu0 %vm205_vm0, %v2283_v42 }
  0x50   :  { %2226 = vmatprep.mubr.msk.bf16.mxu1 %vm205_vm0, %v2284_v43 }
  0x56   :  { %2173 = vmatmul.mubr.msk.bf16.gmra.mrb[36].mxu0 %vm205_vm0, %v2285_v44 }
  0x57   :  { %2227 = vmatmul.mubr.msk.bf16.gmra.mrb[36].mxu1 %vm205_vm0, %v2286_v45  ;;  %2176 = vmatprep.mubr.msk.bf16.mxu0 %vm205_vm0, %v2287_v46 }
  0x58   :  { %2230 = vmatprep.mubr.msk.bf16.mxu1 %vm205_vm0, %v2288_v47 }
  0x5e   :  { %2177 = vmatmul.mubr.msk.bf16.gmra.mrb[40].mxu0 %vm205_vm0, %v2289_v48 }
  0x5f   :  { %2231 = vmatmul.mubr.msk.bf16.gmra.mrb[40].mxu1 %vm205_vm0, %v2290_v49  ;;  %2180 = vmatprep.mubr.msk.bf16.mxu0 %vm205_vm0, %v2291_v50 }
  0x60   :  { %2234 = vmatprep.mubr.msk.bf16.mxu1 %vm205_vm0, %v2292_v51 }
  0x66   :  { %2181 = vmatmul.mubr.msk.bf16.gmra.mrb[44].mxu0 %vm205_vm0, %v2293_v52 }
  0x67   :  { %2235 = vmatmul.mubr.msk.bf16.gmra.mrb[44].mxu1 %vm205_vm0, %v2294_v53 }
  0xe1   :  { %v2138_v54 = vpop.f32.mrb[0].mxu0  ;;  %v2192_v55 = vpop.f32.mrb[0].mxu1 }
  0xe2   :  { %v312_v56 = vpop.f32.mrb[1].mxu0  ;;  %v1042_v57 = vpop.f32.mrb[1].mxu1 }
  0xe3   :  { %v2139_v58 = vpop.f32.mrb[2].mxu0  ;;  %v2193_v60 = vpop.f32.mrb[2].mxu1 }
  0xe4   :  { %v1798_v59 = vpack.c.bf16 %v2139_v58, %v2138_v54  ;;  %v315_v61 = vpop.f32.mrb[3].mxu0  ;;  %v1918_v62 = vpack.c.bf16 %v2193_v60, %v2192_v55  ;;  %v1045_v0 = vpop.f32.mrb[3].mxu1 }
  0xe5   :  { %v1793_v63 = vpack.c.bf16 %v315_v61, %v312_v56  ;;  %v1913_v1 = vpack.c.bf16 %v1045_v0, %v1042_v57 }
  0xe6   :  { %2030 = vst [vmem:[#allocation2 + $0x8] sm:$0xff] %v1798_v59   ;;  %2053 = vst [vmem:[#allocation2 + $0xc8] sm:$0xff] %v1918_v62  }
  0xe7   :  { %1794 = vst [vmem:[#allocation2] sm:$0xff] %v1793_v63   ;;  %1914 = vst [vmem:[#allocation2 + $0xc0] sm:$0xff] %v1913_v1  }
  0xe9   :  { %v2142_v2 = vpop.f32.mrb[4].mxu0  ;;  %v2196_v3 = vpop.f32.mrb[4].mxu1 }
  0xea   :  { %v328_v4 = vpop.f32.mrb[5].mxu0  ;;  %v1058_v5 = vpop.f32.mrb[5].mxu1 }
  0xeb   :  { %v2143_v6 = vpop.f32.mrb[6].mxu0  ;;  %v2197_v8 = vpop.f32.mrb[6].mxu1 }
  0xec   :  { %v1808_v7 = vpack.c.bf16 %v2143_v6, %v2142_v2  ;;  %v331_v9 = vpop.f32.mrb[7].mxu0  ;;  %v1928_v10 = vpack.c.bf16 %v2197_v8, %v2196_v3  ;;  %v1061_v12 = vpop.f32.mrb[7].mxu1 }
  0xed   :  { %v1803_v11 = vpack.c.bf16 %v331_v9, %v328_v4  ;;  %v1923_v13 = vpack.c.bf16 %v1061_v12, %v1058_v5 }
  0xee   :  { %2032 = vst [vmem:[#allocation2 + $0x18] sm:$0xff] %v1808_v7   ;;  %2055 = vst [vmem:[#allocation2 + $0xd8] sm:$0xff] %v1928_v10  }
  0xef   :  { %2031 = vst [vmem:[#allocation2 + $0x10] sm:$0xff] %v1803_v11   ;;  %2054 = vst [vmem:[#allocation2 + $0xd0] sm:$0xff] %v1923_v13  }
  0xf1   :  { %v2146_v14 = vpop.f32.mrb[8].mxu0  ;;  %v2200_v15 = vpop.f32.mrb[8].mxu1 }
  0xf2   :  { %v344_v16 = vpop.f32.mrb[9].mxu0  ;;  %v1074_v17 = vpop.f32.mrb[9].mxu1 }
  0xf3   :  { %v2147_v18 = vpop.f32.mrb[10].mxu0  ;;  %v2201_v20 = vpop.f32.mrb[10].mxu1 }
  0xf4   :  { %v1818_v19 = vpack.c.bf16 %v2147_v18, %v2146_v14  ;;  %v347_v21 = vpop.f32.mrb[11].mxu0  ;;  %v1938_v22 = vpack.c.bf16 %v2201_v20, %v2200_v15  ;;  %v1077_v24 = vpop.f32.mrb[11].mxu1 }
  0xf5   :  { %v1813_v23 = vpack.c.bf16 %v347_v21, %v344_v16  ;;  %v1933_v25 = vpack.c.bf16 %v1077_v24, %v1074_v17 }
  0xf6   :  { %2034 = vst [vmem:[#allocation2 + $0x28] sm:$0xff] %v1818_v19   ;;  %2057 = vst [vmem:[#allocation2 + $0xe8] sm:$0xff] %v1938_v22  }
  0xf7   :  { %2033 = vst [vmem:[#allocation2 + $0x20] sm:$0xff] %v1813_v23   ;;  %2056 = vst [vmem:[#allocation2 + $0xe0] sm:$0xff] %v1933_v25  }
  0xf9   :  { %v2150_v26 = vpop.f32.mrb[12].mxu0  ;;  %v2204_v27 = vpop.f32.mrb[12].mxu1 }
  0xfa   :  { %v360_v28 = vpop.f32.mrb[13].mxu0  ;;  %v1090_v29 = vpop.f32.mrb[13].mxu1 }
  0xfb   :  { %v2151_v30 = vpop.f32.mrb[14].mxu0  ;;  %v2205_v32 = vpop.f32.mrb[14].mxu1 }
  0xfc   :  { %v1828_v31 = vpack.c.bf16 %v2151_v30, %v2150_v26  ;;  %v363_v33 = vpop.f32.mrb[15].mxu0  ;;  %v1948_v34 = vpack.c.bf16 %v2205_v32, %v2204_v27  ;;  %v1093_v36 = vpop.f32.mrb[15].mxu1 }
  0xfd   :  { %v1823_v35 = vpack.c.bf16 %v363_v33, %v360_v28  ;;  %v1943_v37 = vpack.c.bf16 %v1093_v36, %v1090_v29 }
  0xfe   :  { %2036 = vst [vmem:[#allocation2 + $0x38] sm:$0xff] %v1828_v31   ;;  %2059 = vst [vmem:[#allocation2 + $0xf8] sm:$0xff] %v1948_v34  }
  0xff   :  { %2035 = vst [vmem:[#allocation2 + $0x30] sm:$0xff] %v1823_v35   ;;  %2058 = vst [vmem:[#allocation2 + $0xf0] sm:$0xff] %v1943_v37  }
 0x101   :  { %v2154_v38 = vpop.f32.mrb[16].mxu0  ;;  %v2208_v39 = vpop.f32.mrb[16].mxu1 }
 0x102   :  { %v376_v40 = vpop.f32.mrb[17].mxu0  ;;  %v1106_v41 = vpop.f32.mrb[17].mxu1 }
 0x103   :  { %v2155_v42 = vpop.f32.mrb[18].mxu0  ;;  %v2209_v44 = vpop.f32.mrb[18].mxu1 }
 0x104   :  { %v1838_v43 = vpack.c.bf16 %v2155_v42, %v2154_v38  ;;  %v379_v45 = vpop.f32.mrb[19].mxu0  ;;  %v1958_v46 = vpack.c.bf16 %v2209_v44, %v2208_v39  ;;  %v1109_v48 = vpop.f32.mrb[19].mxu1 }
 0x105   :  { %v1833_v47 = vpack.c.bf16 %v379_v45, %v376_v40  ;;  %v1953_v49 = vpack.c.bf16 %v1109_v48, %v1106_v41 }
 0x106   :  { %2038 = vst [vmem:[#allocation2 + $0x48] sm:$0xff] %v1838_v43   ;;  %2061 = vst [vmem:[#allocation2 + $0x108] sm:$0xff] %v1958_v46  }
 0x107   :  { %2037 = vst [vmem:[#allocation2 + $0x40] sm:$0xff] %v1833_v47   ;;  %2060 = vst [vmem:[#allocation2 + $0x100] sm:$0xff] %v1953_v49  }
 0x109   :  { %v2158_v50 = vpop.f32.mrb[20].mxu0 }
 0x10a   :  { %v2212_v51 = vpop.f32.mrb[20].mxu1  ;;  %v392_v52 = vpop.f32.mrb[21].mxu0 }
 0x10b   :  { %v1122_v53 = vpop.f32.mrb[21].mxu1  ;;  %v2159_v54 = vpop.f32.mrb[22].mxu0 }
 0x10c   :  { %v1848_v55 = vpack.c.bf16 %v2159_v54, %v2158_v50  ;;  %v2213_v56 = vpop.f32.mrb[22].mxu1  ;;  %v395_v57 = vpop.f32.mrb[23].mxu0 }
 0x10d   :  { %v1968_v58 = vpack.c.bf16 %v2213_v56, %v2212_v51  ;;  %v1843_v59 = vpack.c.bf16 %v395_v57, %v392_v52  ;;  %v1125_v60 = vpop.f32.mrb[23].mxu1 }
 0x10e   :  { %2040 = vst [vmem:[#allocation2 + $0x58] sm:$0xff] %v1848_v55   ;;  %v1963_v61 = vpack.c.bf16 %v1125_v60, %v1122_v53 }
 0x10f   :  { %2063 = vst [vmem:[#allocation2 + $0x118] sm:$0xff] %v1968_v58   ;;  %2039 = vst [vmem:[#allocation2 + $0x50] sm:$0xff] %v1843_v59  }
 0x110   :  { %2062 = vst [vmem:[#allocation2 + $0x110] sm:$0xff] %v1963_v61  }
 0x111   :  { %v2162_v62 = vpop.f32.mrb[24].mxu0 }
 0x112   :  { %v2216_v63 = vpop.f32.mrb[24].mxu1  ;;  %v408_v0 = vpop.f32.mrb[25].mxu0 }
 0x113   :  { %v1138_v1 = vpop.f32.mrb[25].mxu1  ;;  %v2163_v2 = vpop.f32.mrb[26].mxu0 }
 0x114   :  { %v1858_v3 = vpack.c.bf16 %v2163_v2, %v2162_v62  ;;  %v2217_v4 = vpop.f32.mrb[26].mxu1  ;;  %v411_v5 = vpop.f32.mrb[27].mxu0 }
 0x115   :  { %v1978_v6 = vpack.c.bf16 %v2217_v4, %v2216_v63  ;;  %v1853_v7 = vpack.c.bf16 %v411_v5, %v408_v0  ;;  %v1141_v8 = vpop.f32.mrb[27].mxu1 }
 0x116   :  { %2042 = vst [vmem:[#allocation2 + $0x68] sm:$0xff] %v1858_v3   ;;  %v1973_v9 = vpack.c.bf16 %v1141_v8, %v1138_v1 }
 0x117   :  { %2065 = vst [vmem:[#allocation2 + $0x128] sm:$0xff] %v1978_v6   ;;  %2041 = vst [vmem:[#allocation2 + $0x60] sm:$0xff] %v1853_v7  }
 0x118   :  { %2064 = vst [vmem:[#allocation2 + $0x120] sm:$0xff] %v1973_v9  }
 0x119   :  { %v2166_v10 = vpop.f32.mrb[28].mxu0 }
 0x11a   :  { %v2220_v11 = vpop.f32.mrb[28].mxu1  ;;  %v424_v12 = vpop.f32.mrb[29].mxu0 }
 0x11b   :  { %v1154_v13 = vpop.f32.mrb[29].mxu1  ;;  %v2167_v14 = vpop.f32.mrb[30].mxu0 }
 0x11c   :  { %v1868_v15 = vpack.c.bf16 %v2167_v14, %v2166_v10  ;;  %v2221_v16 = vpop.f32.mrb[30].mxu1  ;;  %v427_v17 = vpop.f32.mrb[31].mxu0 }
 0x11d   :  { %v1988_v18 = vpack.c.bf16 %v2221_v16, %v2220_v11  ;;  %v1863_v19 = vpack.c.bf16 %v427_v17, %v424_v12  ;;  %v1157_v20 = vpop.f32.mrb[31].mxu1 }
 0x11e   :  { %2044 = vst [vmem:[#allocation2 + $0x78] sm:$0xff] %v1868_v15   ;;  %v1983_v21 = vpack.c.bf16 %v1157_v20, %v1154_v13 }
 0x11f   :  { %2067 = vst [vmem:[#allocation2 + $0x138] sm:$0xff] %v1988_v18   ;;  %2043 = vst [vmem:[#allocation2 + $0x70] sm:$0xff] %v1863_v19  }
 0x120   :  { %2066 = vst [vmem:[#allocation2 + $0x130] sm:$0xff] %v1983_v21  }
 0x121   :  { %v2170_v22 = vpop.f32.mrb[32].mxu0 }
 0x122   :  { %v2224_v23 = vpop.f32.mrb[32].mxu1  ;;  %v440_v24 = vpop.f32.mrb[33].mxu0 }
 0x123   :  { %v1170_v25 = vpop.f32.mrb[33].mxu1  ;;  %v2171_v26 = vpop.f32.mrb[34].mxu0 }
 0x124   :  { %v1878_v27 = vpack.c.bf16 %v2171_v26, %v2170_v22  ;;  %v2225_v28 = vpop.f32.mrb[34].mxu1  ;;  %v443_v29 = vpop.f32.mrb[35].mxu0 }
 0x125   :  { %v1998_v30 = vpack.c.bf16 %v2225_v28, %v2224_v23  ;;  %v1873_v31 = vpack.c.bf16 %v443_v29, %v440_v24  ;;  %v1173_v32 = vpop.f32.mrb[35].mxu1 }
 0x126   :  { %2046 = vst [vmem:[#allocation2 + $0x88] sm:$0xff] %v1878_v27   ;;  %v1993_v33 = vpack.c.bf16 %v1173_v32, %v1170_v25 }
 0x127   :  { %2069 = vst [vmem:[#allocation2 + $0x148] sm:$0xff] %v1998_v30   ;;  %2045 = vst [vmem:[#allocation2 + $0x80] sm:$0xff] %v1873_v31  }
 0x128   :  { %2068 = vst [vmem:[#allocation2 + $0x140] sm:$0xff] %v1993_v33  }
 0x129   :  { %v2174_v34 = vpop.f32.mrb[36].mxu0 }
 0x12a   :  { %v2228_v35 = vpop.f32.mrb[36].mxu1  ;;  %v456_v36 = vpop.f32.mrb[37].mxu0 }
 0x12b   :  { %v1186_v37 = vpop.f32.mrb[37].mxu1  ;;  %v2175_v38 = vpop.f32.mrb[38].mxu0 }
 0x12c   :  { %v1888_v39 = vpack.c.bf16 %v2175_v38, %v2174_v34  ;;  %v2229_v40 = vpop.f32.mrb[38].mxu1  ;;  %v459_v41 = vpop.f32.mrb[39].mxu0 }
 0x12d   :  { %v2008_v42 = vpack.c.bf16 %v2229_v40, %v2228_v35  ;;  %v1883_v43 = vpack.c.bf16 %v459_v41, %v456_v36  ;;  %v1189_v44 = vpop.f32.mrb[39].mxu1 }
 0x12e   :  { %2048 = vst [vmem:[#allocation2 + $0x98] sm:$0xff] %v1888_v39   ;;  %v2003_v45 = vpack.c.bf16 %v1189_v44, %v1186_v37 }
 0x12f   :  { %2071 = vst [vmem:[#allocation2 + $0x158] sm:$0xff] %v2008_v42   ;;  %2047 = vst [vmem:[#allocation2 + $0x90] sm:$0xff] %v1883_v43  }
 0x130   :  { %2070 = vst [vmem:[#allocation2 + $0x150] sm:$0xff] %v2003_v45  }
 0x131   :  { %v2178_v46 = vpop.f32.mrb[40].mxu0 }
 0x132   :  { %v2232_v47 = vpop.f32.mrb[40].mxu1  ;;  %v472_v48 = vpop.f32.mrb[41].mxu0 }
 0x133   :  { %v1202_v49 = vpop.f32.mrb[41].mxu1  ;;  %v2179_v50 = vpop.f32.mrb[42].mxu0 }
 0x134   :  { %v1898_v51 = vpack.c.bf16 %v2179_v50, %v2178_v46  ;;  %v2233_v52 = vpop.f32.mrb[42].mxu1  ;;  %v475_v53 = vpop.f32.mrb[43].mxu0 }
 0x135   :  { %v2018_v54 = vpack.c.bf16 %v2233_v52, %v2232_v47  ;;  %v1893_v55 = vpack.c.bf16 %v475_v53, %v472_v48  ;;  %v1205_v56 = vpop.f32.mrb[43].mxu1 }
 0x136   :  { %2050 = vst [vmem:[#allocation2 + $0xa8] sm:$0xff] %v1898_v51   ;;  %v2013_v57 = vpack.c.bf16 %v1205_v56, %v1202_v49 }
 0x137   :  { %2073 = vst [vmem:[#allocation2 + $0x168] sm:$0xff] %v2018_v54   ;;  %2049 = vst [vmem:[#allocation2 + $0xa0] sm:$0xff] %v1893_v55  }
 0x138   :  { %2072 = vst [vmem:[#allocation2 + $0x160] sm:$0xff] %v2013_v57  }
 0x139   :  { %v2182_v58 = vpop.f32.mrb[44].mxu0 }
 0x13a   :  { %v2236_v59 = vpop.f32.mrb[44].mxu1  ;;  %v488_v60 = vpop.f32.mrb[45].mxu0 }
 0x13b   :  { %v1218_v61 = vpop.f32.mrb[45].mxu1  ;;  %v2183_v62 = vpop.f32.mrb[46].mxu0 }
 0x13c   :  { %v1908_v63 = vpack.c.bf16 %v2183_v62, %v2182_v58  ;;  %v2237_v0 = vpop.f32.mrb[46].mxu1  ;;  %v491_v1 = vpop.f32.mrb[47].mxu0 }
 0x13d   :  { %v2028_v2 = vpack.c.bf16 %v2237_v0, %v2236_v59  ;;  %v1903_v3 = vpack.c.bf16 %v491_v1, %v488_v60  ;;  %v1221_v4 = vpop.f32.mrb[47].mxu1 }
 0x13e   :  { %2052 = vst [vmem:[#allocation2 + $0xb8] sm:$0xff] %v1908_v63   ;;  %v2023_v5 = vpack.c.bf16 %v1221_v4, %v1218_v61 }
 0x13f   :  { %2075 = vst [vmem:[#allocation2 + $0x178] sm:$0xff] %v2028_v2   ;;  %2051 = vst [vmem:[#allocation2 + $0xb0] sm:$0xff] %v1903_v3  }
 0x140   :  { %2074 = vst [vmem:[#allocation2 + $0x170] sm:$0xff] %v2023_v5  }
 0x141   :  { %2306 = shalt.err (!%p2303_p4)
}
 0x142   :  { %s2307_s5 = scalar_lea.hbm %s2561_s2, 6144 }
 0x143   :  { %p2308_p5 = scmp.ne.s32.totalorder %s2561_s2, %s2307_s5  ;;  %p2311_p6 = scmp.lt.u32.totalorder %s2307_s5, %s2561_s2 }
 0x145   :  { %p2313_p7 = pnand %p2311_p6, %p2308_p5 }
 0x147   :  { %2316 = shalt.err (!%p2313_p7)
}
 0x148   :  { %s2320_s10 = smov 64   ;;  %s2321_s11 = smov 4  }
 0x149   :  { %1485 = dma.vmem_to_hbm [thread:$0]  %s1480_s29, 6144, %s2561_s2, [#allocation3], %s2320_s10, %s2320_s10, %s2321_s11  }
 0x14a   :  { %2317 = dma.done.wait [#allocation3], 6144  }
 0x14b   :  { %2318 = vsyncadd [#allocation3], 4294961152 }
 0x14c   :  { %1489 = vsyncpa [#allocation3], 1 }

</bundles_post_ra>
